<compile_context>
chip_gen: v6e
topology: v6e:2x2x1
jax: 0.10.0
libtpu: 0.0.40
codegen_flags: <defaults>
</compile_context>

<pallas_src>
import functools

import jax
import jax.numpy as jnp
from jax.experimental import pallas as pl
from jax.experimental.pallas import tpu as pltpu


def _energy_shifter_kernel(se_ref, species_ref, energies_ref, out_ref,
                           *, num_species, fit_intercept):
    # se_ref:       SMEM, (num_species [+1],) float32   (scalar-prefetched)
    # species_ref:  VMEM, (A, tl) int32   (atoms on sublanes, conformations on lanes)
    # energies_ref: VMEM, (1, tl) float32
    # out_ref:      VMEM, (1, tl) float32
    sp = species_ref[...]                                   # (A, tl) int32
    # Gather self energies via a select chain over the (small) species table.
    # Padding (-1) never matches any t in [0, num_species), so it stays 0,
    # matching the PyTorch masking.
    gathered = jnp.zeros(sp.shape, jnp.float32)
    for t in range(num_species):
        gathered = jnp.where(sp == t, se_ref[t], gathered)
    # Single cross-sublane (XLU) reduce per tile.
    sae = jnp.sum(gathered, axis=0, keepdims=True)          # (1, tl)
    if fit_intercept:
        sae = sae + se_ref[num_species]
    out_ref[...] = energies_ref[...] + sae


def _xla_fallback(species, energies, self_energies, num_species, fit_intercept):
    gathered = jnp.where(species >= 0,
                         self_energies[jnp.clip(species, 0, num_species - 1)],
                         0.0)
    sae = gathered.sum(axis=1)
    if fit_intercept:
        sae = sae + self_energies[num_species]
    return energies + sae


def _choose_tile(C, A, tl):
    """Pick a lane-dense conformation tile (multiple of 128)."""
    if tl is None:
        # Target ~2 MiB of species per grid step (amortize ~0.35 us/step).
        tl = max(2048, (2 * 1024 * 1024) // (4 * max(A, 1)))
    tl = max(128, (int(tl) // 128) * 128)
    # Double-buffered species (2 * A * tl * 4 B) kept under ~8 MiB so even
    # v5e's 16 MiB default scoped VMEM has ample headroom (v7x: 32/64 MiB).
    vmem_cap = max(128, ((8 * 1024 * 1024) // (2 * 4 * max(A, 1))) // 128 * 128)
    tl = min(tl, vmem_cap)
    Cp = pl.cdiv(C, 128) * 128
    if Cp >= 256:
        # >= 2 grid steps so v7x's two TensorCores both get work.
        tl = min(tl, max(128, ((Cp // 2) // 128) * 128))
    return min(tl, Cp)


def energy_shifter_forward(species, energies, self_energies,
                           fit_intercept=False, tl=None, force_pallas=None):
    """species: (C, A) int, energies: (C,) float -> (species, shifted energies)."""
    species = species.astype(jnp.int32)
    energies = energies.astype(jnp.float32)
    self_energies = jnp.asarray(self_energies, jnp.float32)

    C, A = species.shape
    num_species = int(self_energies.shape[0]) - (1 if fit_intercept else 0)

    # Small-problem fallback: pallas_call fixed cost + wrapper transpose would
    # dominate; XLA fuses the whole thing into one pass.
    use_pallas = force_pallas
    if use_pallas is None:
        use_pallas = (C * A) >= 100_000
    if not use_pallas:
        return species, _xla_fallback(species, energies, self_energies,
                                      num_species, fit_intercept)

    tl = _choose_tile(C, A, tl)
    grid = pl.cdiv(C, tl)

    # Layout plumbing (single XLA copy): conformations -> lanes.
    species_t = species.T                                   # (A, C)
    energies2d = energies.reshape(1, C)

    kernel = functools.partial(
        _energy_shifter_kernel,
        num_species=num_species,
        fit_intercept=fit_intercept,
    )

    out = pl.pallas_call(
        kernel,
        out_shape=jax.ShapeDtypeStruct((1, C), jnp.float32),
        grid_spec=pltpu.PrefetchScalarGridSpec(
            num_scalar_prefetch=1,            # self_energies -> SMEM
            grid=(grid,),
            in_specs=[
                pl.BlockSpec((A, tl), lambda i, se: (0, i)),
                pl.BlockSpec((1, tl), lambda i, se: (0, i)),
            ],
            out_specs=pl.BlockSpec((1, tl), lambda i, se: (0, i)),
        ),
        compiler_params=pltpu.CompilerParams(
            dimension_semantics=("parallel",)),
    )(self_energies, species_t, energies2d)

    return species, out.reshape(C)


def _reference(species, energies, self_energies, fit_intercept=False):
    species = species.astype(jnp.int32)
    se = self_energies.astype(jnp.float32)
    n = se.shape[0] - (1 if fit_intercept else 0)
    gathered = jnp.where(species >= 0, se[jnp.clip(species, 0, n - 1)], 0.0)
    sae = gathered.sum(axis=1)
    if fit_intercept:
        sae = sae + se[-1]
    return energies.astype(jnp.float32) + sae


if __name__ == "__main__":
    key = jax.random.PRNGKey(0)
    k1, k2, k3, k4, k5, k6 = jax.random.split(key, 6)

    num_species = 4
    self_energies = jnp.array([-0.500607, -38.083038, -54.707756, -75.194466],
                              dtype=jnp.float32)

    # --- small shapes: 16 conformations x 8 atoms (force the Pallas path) ---
    C, A = 16, 8
    species = jax.random.randint(k1, (C, A), minval=-1, maxval=num_species,
                                 dtype=jnp.int32)
    energies = jax.random.normal(k2, (C,), dtype=jnp.float32)

    out_species, out_energies = energy_shifter_forward(
        species, energies, self_energies, fit_intercept=False,
        force_pallas=True)
    out_energies = jax.block_until_ready(out_energies)
    ref = _reference(species, energies, self_energies, fit_intercept=False)
    assert out_species.shape == species.shape
    assert out_energies.shape == (C,)
    assert jnp.allclose(out_energies, ref, atol=1e-3, rtol=1e-5), (
        out_energies, ref)

    # Auto path at this size uses the XLA fallback; check it agrees too.
    _, out_fb = energy_shifter_forward(species, energies, self_energies)
    out_fb = jax.block_until_ready(out_fb)
    assert jnp.allclose(out_fb, ref, atol=1e-3, rtol=1e-5), (out_fb, ref)

    # --- fit_intercept path (last self-energy entry is the intercept) ---
    se_i = jnp.concatenate([self_energies, jnp.array([0.25], jnp.float32)])
    _, out_i = energy_shifter_forward(species, energies, se_i,
                                      fit_intercept=True, force_pallas=True)
    out_i = jax.block_until_ready(out_i)
    ref_i = _reference(species, energies, se_i, fit_intercept=True)
    assert jnp.allclose(out_i, ref_i, atol=1e-3, rtol=1e-5), (out_i, ref_i)

    # --- multi-tile grid + ragged tail (C not a multiple of 128) ---
    C2 = 300
    species2 = jax.random.randint(k3, (C2, A), minval=-1, maxval=num_species,
                                  dtype=jnp.int32)
    energies2 = jax.random.normal(k4, (C2,), dtype=jnp.float32)
    _, out2 = energy_shifter_forward(species2, energies2, self_energies,
                                     fit_intercept=False, tl=128,
                                     force_pallas=True)
    out2 = jax.block_until_ready(out2)
    ref2 = _reference(species2, energies2, self_energies, fit_intercept=False)
    assert out2.shape == (C2,)
    assert jnp.allclose(out2, ref2, atol=1e-3, rtol=1e-5), (out2, ref2)

    # --- larger batch: auto-selects the Pallas path, default (big) tile ---
    C3, A3 = 4096, 32
    species3 = jax.random.randint(k5, (C3, A3), minval=-1, maxval=num_species,
                                  dtype=jnp.int32)
    energies3 = jax.random.normal(k6, (C3,), dtype=jnp.float32)
    _, out3 = energy_shifter_forward(species3, energies3, self_energies)
    out3 = jax.block_until_ready(out3)
    ref3 = _reference(species3, energies3, self_energies, fit_intercept=False)
    assert out3.shape == (C3,)
    assert jnp.allclose(out3, ref3, atol=1e-2, rtol=1e-5), (out3, ref3)

    print("KERNEL_OK")
</pallas_src>

<mosaic_0001>
module attributes {stable_mosaic.version = 11 : i64} {
  func.func @_energy_shifter_kernel(%arg0: i32, %arg1: memref<4xf32, #tpu.memory_space<smem>>, %arg2: memref<8x128xi32, #tpu.memory_space<vmem>>, %arg3: memref<1x128xf32, #tpu.memory_space<vmem>>, %arg4: memref<1x128xf32, #tpu.memory_space<vmem>>) attributes {dimension_semantics = [#tpu.dimension_semantics<parallel>], iteration_bounds = array<i64: 1>, scalar_prefetch = 1 : i64, scratch_operands = 0 : i64, tpu.core_type = #tpu.core_type<tc>, window_params = [{transform_indices = @transform_0, window_bounds = array<i64: 8, 128>}, {transform_indices = @transform_1, window_bounds = array<i64: 1, 128>}, {transform_indices = @transform_2, window_bounds = array<i64: 1, 128>}]} {
    %c0 = arith.constant 0 : index
    %c0_0 = arith.constant 0 : index
    %0 = vector.load %arg2[%c0, %c0_0] : memref<8x128xi32, #tpu.memory_space<vmem>>, vector<8x128xi32>
    %cst = arith.constant 0.000000e+00 : f32
    %1 = vector.broadcast %cst : f32 to vector<8x128xf32>
    %c0_i32 = arith.constant 0 : i32
    %2 = vector.broadcast %c0_i32 : i32 to vector<8x128xi32>
    %3 = arith.cmpi eq, %0, %2 : vector<8x128xi32>
    %c0_1 = arith.constant 0 : index
    %4 = memref.load %arg1[%c0_1] : memref<4xf32, #tpu.memory_space<smem>>
    %5 = vector.broadcast %4 : f32 to vector<8x128xf32>
    %6 = arith.select %3, %5, %1 : vector<8x128xi1>, vector<8x128xf32>
    %c1_i32 = arith.constant 1 : i32
    %7 = vector.broadcast %c1_i32 : i32 to vector<8x128xi32>
    %8 = arith.cmpi eq, %0, %7 : vector<8x128xi32>
    %c1 = arith.constant 1 : index
    %9 = memref.load %arg1[%c1] : memref<4xf32, #tpu.memory_space<smem>>
    %10 = vector.broadcast %9 : f32 to vector<8x128xf32>
    %11 = arith.select %8, %10, %6 : vector<8x128xi1>, vector<8x128xf32>
    %c2_i32 = arith.constant 2 : i32
    %12 = vector.broadcast %c2_i32 : i32 to vector<8x128xi32>
    %13 = arith.cmpi eq, %0, %12 : vector<8x128xi32>
    %c2 = arith.constant 2 : index
    %14 = memref.load %arg1[%c2] : memref<4xf32, #tpu.memory_space<smem>>
    %15 = vector.broadcast %14 : f32 to vector<8x128xf32>
    %16 = arith.select %13, %15, %11 : vector<8x128xi1>, vector<8x128xf32>
    %c3_i32 = arith.constant 3 : i32
    %17 = vector.broadcast %c3_i32 : i32 to vector<8x128xi32>
    %18 = arith.cmpi eq, %0, %17 : vector<8x128xi32>
    %c3 = arith.constant 3 : index
    %19 = memref.load %arg1[%c3] : memref<4xf32, #tpu.memory_space<smem>>
    %20 = vector.broadcast %19 : f32 to vector<8x128xf32>
    %21 = arith.select %18, %20, %16 : vector<8x128xi1>, vector<8x128xf32>
    %cst_2 = arith.constant dense<0.000000e+00> : vector<128xf32>
    %22 = vector.multi_reduction <add>, %21, %cst_2 [0] : vector<8x128xf32> to vector<128xf32>
    %23 = vector.shape_cast %22 : vector<128xf32> to vector<1x128xf32>
    %c0_3 = arith.constant 0 : index
    %c0_4 = arith.constant 0 : index
    %24 = vector.load %arg3[%c0_3, %c0_4] : memref<1x128xf32, #tpu.memory_space<vmem>>, vector<1x128xf32>
    %25 = arith.addf %24, %23 : vector<1x128xf32>
    %c0_5 = arith.constant 0 : index
    %c0_6 = arith.constant 0 : index
    %26 = vector.load %arg4[%c0_5, %c0_6] : memref<1x128xf32, #tpu.memory_space<vmem>>, vector<1x128xf32>
    tpu.vector_store %arg4[%c0_5, %c0_6], %25 {strides = array<i32>} : memref<1x128xf32, #tpu.memory_space<vmem>>, vector<1x128xf32>,
    return
  }
  func.func @transform_0(%arg0: i32, %arg1: memref<4xf32, #tpu.memory_space<smem>>) -> (i32, i32) {
    %c0_i32 = arith.constant 0 : i32
    %c0_i32_0 = arith.constant 0 : i32
    return %c0_i32, %arg0 : i32, i32
  }
  func.func @transform_1(%arg0: i32, %arg1: memref<4xf32, #tpu.memory_space<smem>>) -> (i32, i32) {
    %c0_i32 = arith.constant 0 : i32
    %c0_i32_0 = arith.constant 0 : i32
    return %c0_i32, %arg0 : i32, i32
  }
  func.func @transform_2(%arg0: i32, %arg1: memref<4xf32, #tpu.memory_space<smem>>) -> (i32, i32) {
    %c0_i32 = arith.constant 0 : i32
    %c0_i32_0 = arith.constant 0 : i32
    return %c0_i32, %arg0 : i32, i32
  }
}

</mosaic_0001>

<bundles_post_ra>
// kernel: tpu_custom_call.1
= control target key start
LH: loop header
LB: loop body
LE: loop exit
PB: predicated region body
PF: predicated region fallthrough
CT: control target
= control target key end

     0   :  { %s130_s12 = smov [#allocation3]   ;;  %s165_s0 = inlined_call_operand.hbm [shape: f32[4], index: 0, kind: input, shape index: {}]   ;;  %s166_s1 = inlined_call_operand.hbm [shape: s32[8,16], index: 1, kind: input, shape index: {}]   ;;  %s167_s2 = inlined_call_operand.vmem [shape: f32[1,16], index: 2, kind: input, shape index: {}]   ;;  %s168_s3 = inlined_call_operand.hbm [shape: f32[1,16], index: 3, kind: output, shape index: {}]  }
   0x1   :  { %9 = dma.hbm_to_smem %s165_s0, 16, %s130_s12, [#allocation2] }
   0x2   :  { %124 = dma.done.wait [#allocation2], 16 }
   0x3   :  { %125 = vsyncadd [#allocation2], 4294967280 }
   0x4   :  { %11 = sfence }
   0x5   :  { %12 = vsyncpa [#allocation5], 0 }
   0x6   :  { %13 = vsyncpa [#allocation6], 0  ;;  %s131_s15 = smov [#allocation4]  }
   0x7   :  { %s20_s16 = sshll.u32 %s131_s15, 4  ;;  %s21_s16 = int_to_ptr.vmem [resolvable:$true] %s20_s16 }
   0x8   :  { %s92_s17 = scalar_lea.vmem %s21_s16, 128  ;;  %p97_p1 = scmp.lt.s32.totalorder %s21_s16, %s21_s16 }
   0x9   :  { %p93_p0 = scmp.ne.s32.totalorder %s21_s16, %s92_s17  ;;  %p98_p2 = scmp.lt.s32.totalorder %s92_s17, %s92_s17 }
   0xb   :  { %p99_p3 = por %p98_p2, %p97_p1 }
   0xd   :  { %p100_p4 = pnand %p99_p3, %p93_p0 }
   0xf   :  { %103 = shalt.err (!%p100_p4)
}
  0x10   :  { %23 = dma.hbm_to_vmem [thread:$0]  %s166_s1, 128, %s21_s16, [#allocation5]  }
  0x11   :  { %126 = dma.done.wait [#allocation5], 128  }
  0x12   :  { %127 = vsyncadd [#allocation5], 4294967168  ;;  %s31_s0 = sld [smem:[#allocation3]]  ;;  %v29_v0 = vld [vmem:[#allocation4] sm:$0xff]  ;;  %s132_s24 = smov [#allocation7]  }
  0x13   :  { %s70_s20 = sld [smem:[#allocation3 + $0x1]]  ;;  %vm30_vm0 = vcmp.eq.s32.totalorder %v29_v0, 0  ;;  %vm34_vm1 = vcmp.eq.s32.totalorder %v29_v0, 1  ;;  %vm38_vm2 = vcmp.eq.s32.totalorder %v29_v0, 2  ;;  %vm42_vm3 = vcmp.eq.s32.totalorder %v29_v0, 3  ;;  %s61_s25 = sshll.u32 %s132_s24, 4  ;;  %s62_s25 = int_to_ptr.vmem [resolvable:$true] %s61_s25 }
  0x14   :  { %s71_s21 = sld [smem:[#allocation3 + $0x2]]  ;;  %v52_v14 = vld [vmem:[%s167_s2] sm:$0x1]  ;;  %s104_s26 = scalar_lea.vmem %s62_s25, 16 }
  0x15   :  { %s72_s22 = sld [smem:[#allocation3 + $0x3]]  ;;  %p105_p5 = scmp.ne.s32.totalorder %s62_s25, %s104_s26 }
  0x16   :  { %s108_s27 = scalar_lea.vmem %s62_s25, 32  ;;  %p109_p6 = scmp.lt.s32.totalorder %s62_s25, %s62_s25 }
  0x17   :  { %p110_p7 = scmp.lt.s32.totalorder %s108_s27, %s104_s26 }
  0x18   :  { %v32_v1 = vstv %s31_s0 }
  0x19   :  { %v36_v2 = vstv %s70_s20  ;;  %v33_v3 = vsel %vm30_vm0, %v32_v1, 0.0  ;;  %p111_p8 = por %p110_p7, %p109_p6 }
  0x1a   :  { %v40_v4 = vstv %s71_s21  ;;  %v37_v5 = vsel %vm34_vm1, %v36_v2, %v33_v3 }
  0x1b   :  { %v44_v6 = vstv %s72_s22  ;;  %v41_v7 = vsel %vm38_vm2, %v40_v4, %v37_v5  ;;  %p112_p9 = pnand %p111_p8, %p105_p5 }
  0x1c   :  { %v45_v8 = vsel %vm42_vm3, %v44_v6, %v41_v7 }
  0x1d   :  { %v46_v9 = vrot.slane %v45_v8, 4 }
  0x1f   :  { %v47_v10 = vadd.f32 %v46_v9, %v45_v8 }
  0x21   :  { %v48_v11 = vrot.slane %v47_v10, 2 }
  0x23   :  { %v49_v12 = vadd.f32 %v48_v11, %v47_v10 }
  0x25   :  { %v50_v13 = vrot.slane %v49_v12, 1 }
  0x27   :  { %v51_v15 = vadd.f32 %v50_v13, %v49_v12 }
  0x29   :  { %v53_v16 = vadd.f32 %v52_v14, %v51_v15 }
  0x2b   :  { %54 = vst [vmem:[#allocation7] sm:$0x1] %v53_v16 }
  0x2c   :  { %115 = shalt.err (!%p112_p9)
}
  0x2d   :  { %64 = dma.vmem_to_hbm [thread:$0]  %s62_s25, 16, %s168_s3, [#allocation6]  }
  0x2e   :  { %128 = dma.done.wait [#allocation6], 16  }
  0x2f   :  { %129 = vsyncadd [#allocation6], 4294967280 }
  0x30   :  { %68 = vsyncpa [#allocation5], 1 }
  0x31   :  { %69 = vsyncpa [#allocation6], 1 }

</bundles_post_ra>
